<compile_context>
chip_gen: v6e
topology: v6e:2x2x1
jax: 0.10.0
libtpu: 0.0.40
codegen_flags: <defaults>
</compile_context>

<pallas_src>
import jax
import jax.numpy as jnp
from jax.experimental import pallas as pl
from jax.experimental.pallas import tpu as pltpu


# ----------------------------- Pallas kernels -------------------------------

def gconv_fc_kernel(w_ref, xe_ref, fw_ref, fb_ref, y_ref, stats_ref):
    """Fused gmul + fc for Bb batch elements, plus partial BatchNorm stats.

    w_ref:     (Bb, N, N*J)      adjacency stack, j innermost (free view of W)
    xe_ref:    (Bb, N*J, J*Fin)  block-diagonal expanded node features
    fw_ref:    (J*Fin, Fout)     fc weight, pre-transposed
    fb_ref:    (1, Fout)         fc bias (f32)
    y_ref:     (Bb, N, Fout)     pre-BN output (f32)
    stats_ref: (1, 2, Fout)      per-block [sum, sum_of_squares] over Bb*N rows
    """
    bb, n, _ = w_ref.shape
    fout = fw_ref.shape[1]

    # gmul: one batched MXU matmul; contraction over the combined (m, j) axis.
    gm = jnp.einsum('bnk,bkq->bnq', w_ref[...], xe_ref[...],
                    preferred_element_type=jnp.float32)            # (Bb, N, J*Fin)

    # fc: stack the Bb*N rows and run a single matmul (f32 accumulation).
    gm2 = gm.reshape(bb * n, gm.shape[-1]).astype(fw_ref.dtype)
    y = jnp.dot(gm2, fw_ref[...], preferred_element_type=jnp.float32)
    y = y + fb_ref[...]                                            # (Bb*N, Fout)

    y_ref[...] = y.reshape(bb, n, fout).astype(y_ref.dtype)

    # Partial BatchNorm statistics for this block (reduced in the wrapper).
    stats_ref[0, 0:1, :] = jnp.sum(y, axis=0, keepdims=True)
    stats_ref[0, 1:2, :] = jnp.sum(y * y, axis=0, keepdims=True)


def bn_apply_kernel(y_ref, scale_ref, shift_ref, o_ref):
    """Lane-dense elementwise BN apply: o = y * scale + shift (pre-tiled rows)."""
    o_ref[...] = (y_ref[...] * scale_ref[...] + shift_ref[...]).astype(o_ref.dtype)


# ------------------------------ wrapper (glue) -------------------------------

def _pick_block(total, bytes_per_unit, budget_bytes):
    """Largest block that (i) divides `total`, (ii) fits the VMEM budget,
    and (iii) leaves >= 2 grid steps when possible (v7x has 2 TensorCores)."""
    blk = max(1, min(total, budget_bytes // max(bytes_per_unit, 1)))
    if total >= 2:
        blk = min(blk, max(1, total // 2))
    while total % blk:
        blk -= 1
    return blk


def _compiler_params(est_vmem_bytes):
    kw = dict(dimension_semantics=("parallel",))
    # Raise the scoped-VMEM limit only when blocks get big (v5e default ~16 MiB),
    # capped well below v7x's 64 MiB physical VMEM.
    if est_vmem_bytes > 12 * 1024 * 1024:
        kw["vmem_limit_bytes"] = int(min(2 * est_vmem_bytes, 48 * 1024 * 1024))
    return pltpu.CompilerParams(**kw)


def gconv_forward(W, x, fc_weight, fc_bias, bn_gamma, bn_beta, J,
                  bn_bool=True, compute_dtype=None, eps=1e-5):
    B, N, N2, Jw = W.shape
    assert N2 == N and Jw == J
    Fin = x.shape[-1]
    Fout = fc_weight.shape[0]
    K = J * Fin
    NJ = N * J
    NF = N * Fout

    cdt = jnp.dtype(compute_dtype) if compute_dtype is not None else jnp.dtype(x.dtype)

    # --- zero-copy / tiny wrapper-side prep ----------------------------------
    W2 = W.reshape(B, N, NJ).astype(cdt)         # free row-major view (no HBM pass)
    eye = jnp.eye(J, dtype=cdt)
    xe = (x.astype(cdt)[:, :, None, None, :] * eye[None, None, :, :, None])
    xe = xe.reshape(B, NJ, K)                    # (B, N*J, J*Fin), only J^2*|x| elems
    fw = fc_weight.T.astype(cdt)                 # (J*Fin, Fout)
    fb = fc_bias.reshape(1, Fout).astype(jnp.float32)

    # --- block sizing ----------------------------------------------------------
    itemsize = cdt.itemsize
    per_b = (N * NJ + NJ * K) * itemsize + N * Fout * 4     # buffered bytes / batch
    Bb = _pick_block(B, 2 * per_b, 6 << 20)
    G = B // Bb
    est_vmem = 2 * Bb * per_b + K * Fout * itemsize + 4 * Fout * 4 + 4 * Fout * 4

    y, stats = pl.pallas_call(
        gconv_fc_kernel,
        out_shape=(jax.ShapeDtypeStruct((B, N, Fout), jnp.float32),
                   jax.ShapeDtypeStruct((G, 2, Fout), jnp.float32)),
        grid=(G,),
        in_specs=[
            pl.BlockSpec((Bb, N, NJ), lambda b: (b, 0, 0)),
            pl.BlockSpec((Bb, NJ, K), lambda b: (b, 0, 0)),
            pl.BlockSpec((K, Fout), lambda b: (0, 0)),
            pl.BlockSpec((1, Fout), lambda b: (0, 0)),
        ],
        out_specs=(
            pl.BlockSpec((Bb, N, Fout), lambda b: (b, 0, 0)),
            pl.BlockSpec((1, 2, Fout), lambda b: (b, 0, 0)),
        ),
        compiler_params=_compiler_params(est_vmem),
    )(W2, xe, fw, fb)

    if not bn_bool:
        return W, y.astype(x.dtype)

    # --- tiny (Fout,) stat reduction + affine fold (negligible vs. HBM passes) --
    cnt = jnp.float32(B * N)
    s = jnp.sum(stats, axis=0)                              # (2, Fout)
    mean = s[0] / cnt
    var = jnp.maximum(s[1] / cnt - mean * mean, 0.0)        # biased var (PyTorch BN)
    scale = bn_gamma.astype(jnp.float32) * jax.lax.rsqrt(var + eps)
    shift = bn_beta.astype(jnp.float32) - mean * scale
    scale_row = jnp.tile(scale, N).reshape(1, NF)           # lane-dense (1, N*Fout)
    shift_row = jnp.tile(shift, N).reshape(1, NF)

    # --- lane-dense normalization pass (last dim N*Fout, multiple of 128 here) --
    y_flat = y.reshape(B, NF)                               # free row-major view
    Rb = _pick_block(B, 2 * NF * 4, 6 << 20)
    y_bn = pl.pallas_call(
        bn_apply_kernel,
        out_shape=jax.ShapeDtypeStruct((B, NF), x.dtype),
        grid=(B // Rb,),
        in_specs=[
            pl.BlockSpec((Rb, NF), lambda i: (i, 0)),
            pl.BlockSpec((1, NF), lambda i: (0, 0)),
            pl.BlockSpec((1, NF), lambda i: (0, 0)),
        ],
        out_specs=pl.BlockSpec((Rb, NF), lambda i: (i, 0)),
        compiler_params=_compiler_params(4 * Rb * NF * 4),
    )(y_flat, scale_row, shift_row)

    # TODO(synk): BatchNorm running-mean/var buffer updates (a training-time side
    # effect in PyTorch) are not modeled; the forward output itself matches.
    return W, y_bn.reshape(B, N, Fout)


# ---------------------------- pure-JAX reference -----------------------------

def gconv_ref(W, x, fc_weight, fc_bias, gamma, beta, J, bn=True):
    B, N = W.shape[0], W.shape[1]
    Fin = x.shape[-1]
    parts = [jnp.einsum('bnm,bmf->bnf', W[..., j], x) for j in range(J)]
    gm = jnp.concatenate(parts, axis=2)                     # (B, N, J*Fin)
    y = gm.reshape(-1, J * Fin) @ fc_weight.T + fc_bias     # (B*N, Fout)
    if bn:
        mean = y.mean(axis=0)
        var = ((y - mean) ** 2).mean(axis=0)
        y = (y - mean) / jnp.sqrt(var + 1e-5) * gamma + beta
    return y.reshape(B, N, -1)


# ----------------------------------- main ------------------------------------

if __name__ == "__main__":
    B, N, J, Fin, Fout = 2, 16, 2, 8, 32     # num_inputs = J*Fin = 16

    key = jax.random.PRNGKey(0)
    kW, kx, kfw, kfb, kg, kb = jax.random.split(key, 6)

    W = jax.random.normal(kW, (B, N, N, J), dtype=jnp.float32)
    x = jax.random.normal(kx, (B, N, Fin), dtype=jnp.float32)

    # Deterministic parameter init (nn.Linear-like uniform bound, BN gamma/beta).
    bound = 1.0 / (J * Fin) ** 0.5
    fc_weight = jax.random.uniform(kfw, (Fout, J * Fin), jnp.float32, -bound, bound)
    fc_bias = jax.random.uniform(kfb, (Fout,), jnp.float32, -bound, bound)
    bn_gamma = 1.0 + 0.1 * jax.random.normal(kg, (Fout,), jnp.float32)
    bn_beta = 0.1 * jax.random.normal(kb, (Fout,), jnp.float32)

    # f32 path with BatchNorm (tight check vs pure-JAX reference).
    W_out, y_out = gconv_forward(W, x, fc_weight, fc_bias, bn_gamma, bn_beta, J)
    jax.block_until_ready(y_out)
    ref_bn = gconv_ref(W, x, fc_weight, fc_bias, bn_gamma, bn_beta, J, bn=True)
    assert y_out.shape == (B, N, Fout)
    assert jnp.allclose(y_out, ref_bn, atol=1e-4, rtol=1e-4), "BN path mismatch"
    assert jnp.array_equal(W_out, W)

    # bn_bool=False path.
    _, y_nobn = gconv_forward(W, x, fc_weight, fc_bias, bn_gamma, bn_beta, J,
                              bn_bool=False)
    jax.block_until_ready(y_nobn)
    ref_nobn = gconv_ref(W, x, fc_weight, fc_bias, bn_gamma, bn_beta, J, bn=False)
    assert jnp.allclose(y_nobn, ref_nobn, atol=1e-4, rtol=1e-4), "no-BN path mismatch"

    # bf16 MXU-input path (f32 accumulation, f32 BN math) -- looser tolerance.
    _, y_bf16 = gconv_forward(W, x, fc_weight, fc_bias, bn_gamma, bn_beta, J,
                              compute_dtype=jnp.bfloat16)
    jax.block_until_ready(y_bf16)
    assert jnp.allclose(y_bf16.astype(jnp.float32), ref_bn, atol=1e-1, rtol=1e-1), \
        "bf16 path mismatch"

    print("KERNEL_OK")
</pallas_src>

<mosaic_0001>
module attributes {stable_mosaic.version = 11 : i64} {
  func.func @gconv_fc_kernel(%arg0: i32, %arg1: memref<1x16x32xf32, #tpu.memory_space<vmem>>, %arg2: memref<1x32x16xf32, #tpu.memory_space<vmem>>, %arg3: memref<16x32xf32, #tpu.memory_space<vmem>>, %arg4: memref<1x32xf32, #tpu.memory_space<vmem>>, %arg5: memref<1x16x32xf32, #tpu.memory_space<vmem>>, %arg6: memref<1x2x32xf32, #tpu.memory_space<vmem>>) attributes {dimension_semantics = [#tpu.dimension_semantics<parallel>], iteration_bounds = array<i64: 2>, scalar_prefetch = 0 : i64, scratch_operands = 0 : i64, tpu.core_type = #tpu.core_type<tc>, window_params = [{transform_indices = @transform_0, window_bounds = array<i64: 1, 16, 32>}, {transform_indices = @transform_1, window_bounds = array<i64: 1, 32, 16>}, {pipeline_mode = #tpu.pipeline_mode<synchronous>, transform_indices = @transform_2, window_bounds = array<i64: 16, 32>}, {pipeline_mode = #tpu.pipeline_mode<synchronous>, transform_indices = @transform_3, window_bounds = array<i64: 1, 32>}, {transform_indices = @transform_4, window_bounds = array<i64: 1, 16, 32>}, {transform_indices = @transform_5, window_bounds = array<i64: 1, 2, 32>}]} {
    %c0 = arith.constant 0 : index
    %c0_0 = arith.constant 0 : index
    %c0_1 = arith.constant 0 : index
    %0 = vector.load %arg1[%c0, %c0_0, %c0_1] : memref<1x16x32xf32, #tpu.memory_space<vmem>>, vector<1x16x32xf32>
    %c0_2 = arith.constant 0 : index
    %c0_3 = arith.constant 0 : index
    %c0_4 = arith.constant 0 : index
    %1 = vector.load %arg2[%c0_2, %c0_3, %c0_4] : memref<1x32x16xf32, #tpu.memory_space<vmem>>, vector<1x32x16xf32>
    "tpu.trace_start"() <{level = 10 : i32, message = "bnk,bkq->bnq"}> : () -> ()
    %cst = arith.constant dense<0.000000e+00> : vector<1x16x16xf32>
    %2 = tpu.matmul %0, %1, %cst {dimension_numbers = #tpu.dot_dimension_numbers<[2], [1], [1], [2], [0, 0, 0, 1, 1, 2], [0], [0]>} : vector<1x16x32xf32>, vector<1x32x16xf32>, vector<1x16x16xf32> -> vector<1x16x16xf32>
    "tpu.trace_stop"() : () -> ()
    %3 = vector.shape_cast %2 : vector<1x16x16xf32> to vector<16x16xf32>
    %c0_5 = arith.constant 0 : index
    %c0_6 = arith.constant 0 : index
    %4 = vector.load %arg3[%c0_5, %c0_6] : memref<16x32xf32, #tpu.memory_space<vmem>>, vector<16x32xf32>
    %cst_7 = arith.constant dense<0.000000e+00> : vector<16x32xf32>
    %5 = tpu.matmul %3, %4, %cst_7 {dimension_numbers = #tpu.dot_dimension_numbers<[1], [0], [0], [1], [0, 0, 1, 1], [], []>} : vector<16x16xf32>, vector<16x32xf32>, vector<16x32xf32> -> vector<16x32xf32>
    %c0_8 = arith.constant 0 : index
    %c0_9 = arith.constant 0 : index
    %6 = vector.load %arg4[%c0_8, %c0_9] : memref<1x32xf32, #tpu.memory_space<vmem>>, vector<1x32xf32>
    %7 = vector.broadcast %6 : vector<1x32xf32> to vector<16x32xf32>
    %8 = arith.addf %5, %7 : vector<16x32xf32>
    %9 = vector.shape_cast %8 : vector<16x32xf32> to vector<1x16x32xf32>
    %c0_10 = arith.constant 0 : index
    %c0_11 = arith.constant 0 : index
    %c0_12 = arith.constant 0 : index
    %10 = vector.load %arg5[%c0_10, %c0_11, %c0_12] : memref<1x16x32xf32, #tpu.memory_space<vmem>>, vector<1x16x32xf32>
    tpu.vector_store %arg5[%c0_10, %c0_11, %c0_12], %9 {strides = array<i32>} : memref<1x16x32xf32, #tpu.memory_space<vmem>>, vector<1x16x32xf32>,
    %cst_13 = arith.constant dense<0.000000e+00> : vector<32xf32>
    %11 = vector.multi_reduction <add>, %8, %cst_13 [0] : vector<16x32xf32> to vector<32xf32>
    %12 = vector.shape_cast %11 : vector<32xf32> to vector<1x32xf32>
    %c0_14 = arith.constant 0 : index
    %c0_15 = arith.constant 0 : index
    %c0_16 = arith.constant 0 : index
    %13 = vector.load %arg6[%c0_14, %c0_15, %c0_16] : memref<1x2x32xf32, #tpu.memory_space<vmem>>, vector<1x1x32xf32>
    %14 = vector.shape_cast %13 : vector<1x1x32xf32> to vector<1x32xf32>
    %15 = vector.shape_cast %12 : vector<1x32xf32> to vector<1x1x32xf32>
    tpu.vector_store %arg6[%c0_14, %c0_15, %c0_16], %15 {strides = array<i32>} : memref<1x2x32xf32, #tpu.memory_space<vmem>>, vector<1x1x32xf32>,
    %16 = arith.mulf %8, %8 : vector<16x32xf32>
    %cst_17 = arith.constant dense<0.000000e+00> : vector<32xf32>
    %17 = vector.multi_reduction <add>, %16, %cst_17 [0] : vector<16x32xf32> to vector<32xf32>
    %18 = vector.shape_cast %17 : vector<32xf32> to vector<1x32xf32>
    %c0_18 = arith.constant 0 : index
    %c1 = arith.constant 1 : index
    %c0_19 = arith.constant 0 : index
    %19 = vector.load %arg6[%c0_18, %c1, %c0_19] : memref<1x2x32xf32, #tpu.memory_space<vmem>>, vector<1x1x32xf32>
    %20 = vector.shape_cast %19 : vector<1x1x32xf32> to vector<1x32xf32>
    %21 = vector.shape_cast %18 : vector<1x32xf32> to vector<1x1x32xf32>
    tpu.vector_store %arg6[%c0_18, %c1, %c0_19], %21 {strides = array<i32>} : memref<1x2x32xf32, #tpu.memory_space<vmem>>, vector<1x1x32xf32>,
    return
  }
  func.func @transform_0(%arg0: i32) -> (i32, i32, i32) {
    %c0_i32 = arith.constant 0 : i32
    %c0_i32_0 = arith.constant 0 : i32
    %c0_i32_1 = arith.constant 0 : i32
    return %arg0, %c0_i32, %c0_i32_0 : i32, i32, i32
  }
  func.func @transform_1(%arg0: i32) -> (i32, i32, i32) {
    %c0_i32 = arith.constant 0 : i32
    %c0_i32_0 = arith.constant 0 : i32
    %c0_i32_1 = arith.constant 0 : i32
    return %arg0, %c0_i32, %c0_i32_0 : i32, i32, i32
  }
  func.func @transform_2(%arg0: i32) -> (i32, i32) {
    %c0_i32 = arith.constant 0 : i32
    %c0_i32_0 = arith.constant 0 : i32
    %c0_i32_1 = arith.constant 0 : i32
    return %c0_i32, %c0_i32_0 : i32, i32
  }
  func.func @transform_3(%arg0: i32) -> (i32, i32) {
    %c0_i32 = arith.constant 0 : i32
    %c0_i32_0 = arith.constant 0 : i32
    %c0_i32_1 = arith.constant 0 : i32
    return %c0_i32, %c0_i32_0 : i32, i32
  }
  func.func @transform_4(%arg0: i32) -> (i32, i32, i32) {
    %c0_i32 = arith.constant 0 : i32
    %c0_i32_0 = arith.constant 0 : i32
    %c0_i32_1 = arith.constant 0 : i32
    return %arg0, %c0_i32, %c0_i32_0 : i32, i32, i32
  }
  func.func @transform_5(%arg0: i32) -> (i32, i32, i32) {
    %c0_i32 = arith.constant 0 : i32
    %c0_i32_0 = arith.constant 0 : i32
    %c0_i32_1 = arith.constant 0 : i32
    return %arg0, %c0_i32, %c0_i32_0 : i32, i32, i32
  }
}

</mosaic_0001>

<bundles_post_ra>
// kernel: tpu_custom_call.1
= control target key start
LH: loop header
LB: loop body
LE: loop exit
PB: predicated region body
PF: predicated region fallthrough
CT: control target
= control target key end

     0   :  { %11 = vsyncpa [#allocation3], 0  ;;  %s964_s0 = inlined_call_operand.vmem [shape: f32[2,16,32], index: 0, kind: input, shape index: {}]   ;;  %s965_s1 = inlined_call_operand.vmem [shape: f32[2,32,16], index: 1, kind: input, shape index: {}]   ;;  %s966_s2 = inlined_call_operand.vmem [shape: f32[16,32], index: 2, kind: input, shape index: {}]   ;;  %s967_s3 = inlined_call_operand.vmem [shape: f32[1,32], index: 3, kind: input, shape index: {}]   ;;  %s968_s4 = inlined_call_operand.hbm [shape: f32[2,16,32], index: 4, kind: output, shape index: {0}]   ;;  %s969_s5 = inlined_call_operand.hbm [shape: f32[2,2,32], index: 5, kind: output, shape index: {1}]  }
   0x1   :  { %13 = vsyncpa [#allocation3 + $0x1], 0 }
   0x2   :  { %14 = vsyncpa [#allocation5], 0 }
   0x3   :  { %16 = vsyncpa [#allocation5 + $0x1], 0  ;;  %s821_s18 = smov 0   ;;  %s823_s19 = smov 0  }
   0x4   :  { %s825_s20 = smov 0   ;;  %s827_s21 = smov 0  }
   0x5 LB: > { %s842_s22 = sadd.s32 4294967295, %s785_s21   ;;  %s596_s23 = sadd.s32 4294967294, %s785_s21   ;;  %s785_s21 = sphi %s827_s21, %s975_s21   ;;  %s781_s20 = sphi %s825_s20, %s974_s20   ;;  %s777_s19 = sphi %s823_s19, %s973_s19   ;;  %s773_s18 = sphi %s821_s18, %s972_s18  }
   0x6   : > { %s846_s24 = sadd.s32 1, %s785_s21   ;;  %s123_s25 = sadd.s32 1, %s781_s20 }
   0x7   : > { %s120_s26 = ssub.s32 %s785_s21, %s846_s24  ;;  %p133_p0 = scmp.ne.s32.totalorder %s781_s20, %s777_s19 }
   0x8   : > { %p121_p1 = scmp.eq.s32.totalorder %s120_s26, 0  ;;  %p134_p2 = scmp.eq.s32.totalorder %s842_s22, 1 }
   0x9   : > { %p139_p3 = scmp.ne.s32.totalorder %s777_s19, %s773_s18  ;;  %p140_p4 = scmp.eq.s32.totalorder %s596_s23, 1 }
   0xa   : > { %s857_s27 = scalar_select %p121_p1, %s781_s20, %s123_s25  }
   0xb   : > { %p859_p5 = por %p134_p2, %p133_p0  ;;  %p863_p6 = por %p140_p4, %p139_p3 }
   0xc   : > { %p599_p7 = scmp.ge.s32.totalorder %s785_s21, 1  ;;  %p206_p8 = scmp.lt.s32.totalorder %s785_s21, 3 }
   0xe   : > { %p207_p9 = pnand %p599_p7, %p206_p8 }
   0xf   : > { %p244_p10 = scmp.lt.s32.totalorder (!%p207_p9), %s842_s22, 1  ;;  %s886_s23 = sand.u32 (!%p207_p9), 1, %s777_s19  }
  0x10   : > { %210 = sbr.rel (%p207_p9) target bundleno = 468 (0x1d4), region = 36  ;;  %s600_s25 = sshll.u32 (!%p207_p9), %s886_s23, 4 }
  0x11   : > { %s620_s8 = sshll.u32 (!%p207_p9), %s842_s22, 8  ;;  %s459_s12 = scalar_lea.sflag (!%p207_p9), [#allocation3], %s886_s23 }
  0x12   : > { %s898_s11 = scalar_lea.hbm (!%p207_p9), %s968_s4, %s620_s8  ;;  %s787_s14 = smov (!%p207_p9), [#allocation2]  }
  0x13   : > { %s699_s15 = sshll.u32 (!%p207_p9), %s787_s14, 4  ;;  %s700_s15 = int_to_ptr.vmem [resolvable:$false] %s699_s15 }
  0x14   : > { %s701_s16 = scalar_lea.vmem (!%p207_p9), %s700_s15, 512 }
  0x15   : > { %s245_s30 = scalar_select %p244_p10, %s842_s22, 1  ;;  %vm260_vm0 = vcmask 261120   ;;  %v343_v6 = vld [vmem:[%s966_s2 + $0x8] sm:$0xff]  ;;  %v342_v7 = vld [vmem:[%s966_s2] sm:$0xff]  ;;  %vm351_vm1 = vcmask 130048  }
  0x16   : > { %642 = vmatprep.subr.mxu1 %v343_v6  ;;  %v608_v10 = vld [vmem:[%s967_s3] ss:$0 sm:$0xff] }
  0x17   : > { %s619_s6 = sshll.u32 %s245_s30, 5  ;;  %s618_s7 = sshll.u32 %s245_s30, 4  ;;  %643 = vmatpush3.msra.mxu1 %v343_v6 }
  0x18   : > { %s253_s10 = scalar_lea.vmem %s965_s1, %s619_s6  ;;  %s248_s13 = scalar_lea.vmem %s964_s0, %s618_s7  ;;  %644 = vmatprep.subr.mxu1 %v342_v7 }
  0x19   : > { %v259_v0 = vld [vmem:[%s253_s10 + $0x18] sm:$0xff]  ;;  %v258_v1 = vld [vmem:[%s253_s10 + $0x10] sm:$0xff]  ;;  %v254_v2 = vld [vmem:[%s248_s13] sm:$0xff]  ;;  %645 = vmatpush3.msra.mxu1 %v342_v7  ;;  %s236_s6 = scalar_lea.vmem [#allocation2], %s600_s25 }
  0x1a   : > { %631 = vmatprep.subr.mxu0 %v259_v0  ;;  %v257_v3 = vld [vmem:[%s253_s10 + $0x8] sm:$0xff]  ;;  %639 = vmatprep.mubr.msk.f32.mxu0 %vm260_vm0, %v254_v2  ;;  %v256_v4 = vld [vmem:[%s253_s10] sm:$0xff]  ;;  %s477_s7 = sshll.u32 %s236_s6, 4  ;;  %s893_s7 = int_to_ptr.vmem [resolvable:$true] %s477_s7 }
  0x1b   : > { %632 = vmatpush3.msra.mxu0 %v259_v0  ;;  %v255_v5 = vld [vmem:[%s248_s13 + $0x8] sm:$0xff]  ;;  %s695_s13 = scalar_lea.vmem %s893_s7, 256  ;;  %p702_p0 = scmp.lt.s32.totalorder %s893_s7, %s700_s15 }
  0x1c   : > { %633 = vmatprep.subr.mxu0 %v258_v1  ;;  %p696_p11 = scmp.ne.s32.totalorder %s893_s7, %s695_s13  ;;  %p703_p1 = scmp.lt.s32.totalorder %s701_s16, %s695_s13 }
  0x1d   : > { %634 = vmatpush3.msra.mxu0 %v258_v1 }
  0x1e   : > { %635 = vmatprep.subr.mxu0 %v257_v3  ;;  %p697_p12 = pnand %p696_p11, %p859_p5  ;;  %p704_p2 = por %p703_p1, %p702_p0 }
  0x1f   : > { %636 = vmatpush3.msra.mxu0 %v257_v3 }
  0x20   : > { %637 = vmatprep.subr.mxu0 %v256_v4  ;;  %p698_p13 = pneg %p697_p12 }
  0x21   : > { %638 = vmatpush3.msra.mxu0 %v256_v4 }
  0x22   : > { %640 = vmatmul.mubr.msk.f32.vlgmr.msra.gmra.mxu0 %vm260_vm0, %v255_v5  ;;  %p705_p3 = pnand %p704_p2, %p698_p13 }
  0xe2   : > { %v641_v8 = vpop.f32.mrf.mxu0 }
  0xe4   : > { %v333_v9 = vpop.f32.mrf.mxu0 }
  0xe5   : > { %646 = vmatprep.mubr.msk.f32.mxu1 %vm351_vm1, %v333_v9 }
  0xe6   : > { %647 = vmatmul.mubr.msk.f32.vlgmr.msra.gmra.mxu1 %vm351_vm1, %v641_v8 }
 0x1a6   : > { %v648_v11 = vpop.f32.mrf.mxu1 }
 0x1a7   : > { %v430_v12 = vadd.f32 %v648_v11, %v608_v10 }
 0x1a8   : > { %v424_v13 = vpop.f32.mrf.mxu1 }
 0x1a9   : > { %434 = vst.msk [vmem:[%s236_s6 + $0x8] sm:$0xff] %vm260_vm0, %v430_v12  ;;  %v447_v14 = vmul.f32 %v430_v12, %v430_v12  ;;  %v425_v15 = vadd.f32 %v608_v10, %v424_v13  ;;  %v436_v16 = vsel %vm260_vm0, %v430_v12, 0.0 }
 0x1ab   : > { %433 = vst.msk [vmem:[%s236_s6] sm:$0xff] %vm260_vm0, %v425_v15  ;;  %v435_v17 = vsel %vm260_vm0, %v425_v15, 0.0  ;;  %v446_v18 = vmul.f32 %v425_v15, %v425_v15 }
 0x1ac   : > { %v437_v19 = vadd.f32 %v436_v16, %v435_v17 }
 0x1ad   : > { %708 = shalt.err (!%p705_p3)
}
 0x1ae   : > { %s709_s17 = scalar_lea.hbm %s898_s11, 256  ;;  %s713_s30 = scalar_lea.hbm %s968_s4, 512 }
 0x1af   : > { %p710_p4 = scmp.ne.s32.totalorder %s898_s11, %s709_s17  ;;  %p714_p9 = scmp.lt.s32.totalorder %s898_s11, %s968_s4 }
 0x1b0   : > { %p715_p10 = scmp.lt.s32.totalorder %s713_s30, %s709_s17 }
 0x1b1   : > { %p711_p7 = pnand %p710_p4, %p859_p5 }
 0x1b2   : > { %p716_p11 = por %p715_p10, %p714_p9 }
 0x1b3   : > { %p712_p8 = pneg %p711_p7 }
 0x1b5   : > { %p717_p12 = pnand %p716_p11, %p712_p8 }
 0x1b7   : > { %720 = shalt.err (!%p717_p12)
}
 0x1b8   : > { %s788_s9 = smov 128   ;;  %s789_s10 = smov 8   ;;  %v449_v20 = vsel %vm260_vm0, %v447_v14, 0.0  ;;  %v448_v21 = vsel %vm260_vm0, %v446_v18, 0.0  ;;  %v438_v22 = vrot.slane %v437_v19, 4  ;;  %vm444_vm2 = vcmask 253952  }
 0x1b9   : > { %649 = dma.vmem_to_hbm [thread:$0]  (%p859_p5), %s893_s7, 256, %s898_s11, %s459_s12, %s788_s9, %s788_s9, %s789_s10   ;;  %v450_v23 = vadd.f32 %v449_v20, %v448_v21 }
 0x1ba   : > { %v439_v24 = vadd.f32 %v438_v22, %v437_v19  ;;  %s601_s13 = sshll.u32 %s886_s23, 1  ;;  %s615_s14 = sshll.u32 %s842_s22, 5 }
 0x1bb   : > { %v451_v25 = vrot.slane %v450_v23, 4  ;;  %s243_s7 = scalar_lea.vmem [#allocation4], %s601_s13  ;;  %s491_s16 = scalar_lea.hbm %s969_s5, %s615_s14 }
 0x1bc   : > { %v440_v26 = vrot.slane %v439_v24, 2  ;;  %s493_s11 = sshll.u32 %s243_s7, 4  ;;  %s464_s17 = scalar_lea.sflag [#allocation5], %s886_s23  ;;  %s494_s11 = int_to_ptr.vmem [resolvable:$true] %s493_s11 }
 0x1bd   : > { %v452_v27 = vadd.f32 %v451_v25, %v450_v23  ;;  %s721_s25 = scalar_lea.vmem %s494_s11, 32  ;;  %s790_s26 = smov [#allocation4]  }
 0x1be   : > { %v441_v28 = vadd.f32 %v440_v26, %v439_v24  ;;  %p722_p13 = scmp.ne.s32.totalorder %s494_s11, %s721_s25  ;;  %s725_s22 = sshll.u32 %s790_s26, 4  ;;  %s726_s22 = int_to_ptr.vmem [resolvable:$false] %s725_s22 }
 0x1bf   : > { %v453_v29 = vrot.slane %v452_v27, 2  ;;  %s727_s30 = scalar_lea.vmem %s726_s22, 64  ;;  %p728_p2 = scmp.lt.s32.totalorder %s494_s11, %s726_s22 }
 0x1c0   : > { %v442_v30 = vrot.slane %v441_v28, 1  ;;  %p723_p0 = pnand %p722_p13, %p859_p5  ;;  %p729_p3 = scmp.lt.s32.totalorder %s727_s30, %s721_s25 }
 0x1c1   : > { %v454_v31 = vadd.f32 %v453_v29, %v452_v27 }
 0x1c2   : > { %v443_v32 = vadd.f32 %v442_v30, %v441_v28  ;;  %p724_p1 = pneg %p723_p0  ;;  %p730_p4 = por %p729_p3, %p728_p2 }
 0x1c3   : > { %v455_v33 = vrot.slane %v454_v31, 1 }
 0x1c4   : > { %445 = vst.msk [vmem:[%s243_s7] sm:$0x1] %vm444_vm2, %v443_v32  ;;  %p731_p7 = pnand %p730_p4, %p724_p1 }
 0x1c5   : > { %v456_v34 = vadd.f32 %v455_v33, %v454_v31 }
 0x1c7   : > { %457 = vst.msk [vmem:[%s243_s7 + $0x1] sm:$0x1] %vm444_vm2, %v456_v34 }
 0x1c8   : > { %734 = shalt.err (!%p731_p7)
}
 0x1c9   : > { %s735_s6 = scalar_lea.hbm %s491_s16, 32  ;;  %s739_s9 = scalar_lea.hbm %s969_s5, 64 }
 0x1ca   : > { %p736_p8 = scmp.ne.s32.totalorder %s491_s16, %s735_s6  ;;  %p740_p11 = scmp.lt.s32.totalorder %s491_s16, %s969_s5 }
 0x1cb   : > { %p741_p12 = scmp.lt.s32.totalorder %s739_s9, %s735_s6 }
 0x1cc   : > { %p737_p9 = pnand %p736_p8, %p859_p5 }
 0x1cd   : > { %p742_p13 = por %p741_p12, %p740_p11 }
 0x1ce   : > { %p738_p10 = pneg %p737_p9 }
 0x1d0   : > { %p743_p0 = pnand %p742_p13, %p738_p10 }
 0x1d2   : > { %746 = shalt.err (!%p743_p0)
}
 0x1d3   : > { %650 = dma.vmem_to_hbm [thread:$0]  (%p859_p5), %s494_s11, 32, %s491_s16, %s464_s17  }
 0x1d4 PF: > { %p660_p1 = scmp.ge.s32.totalorder %s785_s21, 2  ;;  %s505_s14 = sand.u32 1, %s773_s18  }
 0x1d5   : > { %s506_s7 = scalar_lea.sflag [#allocation3], %s505_s14 }
 0x1d6   : > { %p654_p2 = pnand %p660_p1, %p863_p6 }
 0x1d8   : > { %p655_p3 = pneg %p654_p2 }
 0x1da   : > { %764 = dma.done.wait (%p655_p3), %s506_s7, 256  }
 0x1db   : > { %766 = vsyncadd (%p655_p3), %s506_s7, 4294967040  ;;  %s515_s12 = scalar_lea.sflag [#allocation5], %s505_s14 }
 0x1dc   : > { %768 = dma.done.wait (%p655_p3), %s515_s12, 32  }
 0x1dd   : > { %770 = vsyncadd (%p655_p3), %s515_s12, 4294967264  ;;  %p19_p5 = scmp.ge.s32.totalorder %s846_s24, 4   ;;  %s972_s18 = smov %s777_s19 }
 0x1de   : > { %s973_s19 = smov %s781_s20  ;;  %s974_s20 = smov %s857_s27 }
 0x1df   : > { %s975_s21 = smov %s846_s24  ;;  %21 = sbr.rel (!%p19_p5) target bundleno = 5 (0x5), region = 91 }
 0x1e4   :  { %520 = vsyncpa [#allocation3], 1 }
 0x1e5   :  { %522 = vsyncpa [#allocation3 + $0x1], 1 }
 0x1e6   :  { %523 = vsyncpa [#allocation5], 1 }
 0x1e7   :  { %525 = vsyncpa [#allocation5 + $0x1], 1 }

</bundles_post_ra>
